<compile_context>
chip_gen: v5e
topology: v5e:2x2
jax: 0.10.0
libtpu: 0.0.40
codegen_flags: <defaults>
</compile_context>

<pallas_src>
import math
import functools

import jax
import jax.numpy as jnp
from jax.experimental import pallas as pl
from jax.experimental.pallas import tpu as pltpu


def _rnn_kernel(x_ref, wih_ref, whh_ref, b_ref, wl_ref, bl_ref,
                out_ref, hid_ref, *, batch, seq_len):
    """ReLU-RNN forward, batch-major.

    x_ref   : (B*S, D)  inputs, rows in batch-major order (row = b*S + s)
    wih_ref : (D, H)
    whh_ref : (H, H)
    b_ref   : (1, H)    recurrence bias
    wl_ref  : (H, 1)    linear head weight (transposed)
    bl_ref  : (1, 1)    linear head bias (SMEM scalar)
    out_ref : (B, S, 1)
    hid_ref : (B, S, H)
    """
    B, S = batch, seq_len
    H = whh_ref.shape[0]

    whh = whh_ref[...]                                     # (H, H), loaded once

    # ---- Hoisted input projection + bias: one batched MXU matmul, entirely
    #      off the serial critical path (no dependence on h). ----
    xp = (jnp.dot(x_ref[...], wih_ref[...],
                  preferred_element_type=jnp.float32)
          + b_ref[...])                                    # (B*S, H)
    xp = xp.reshape(B, S, H)                               # leading-dim split only

    # ---- Serial ReLU recurrence. h lives in vregs (no scratch round-trip);
    #      loop fully unrolled (S is small & static) so the scheduler can
    #      overlap the hid store of step t with the matmul of step t+1. ----
    h = jnp.zeros((B, H), jnp.float32)                     # init_hidden(): zeros
    for t in range(S):
        h = jnp.maximum(
            xp[:, t, :]
            + jnp.dot(h, whh, preferred_element_type=jnp.float32),
            0.0)
        hid_ref[:, t, :] = h                               # only store in the step

    # ---- Linear head applied once to the whole sequence (one matmul,
    #      one bulk store) instead of once per timestep. ----
    hidden = hid_ref[...].reshape(B * S, H)
    out = (jnp.dot(hidden, wl_ref[...], preferred_element_type=jnp.float32)
           + bl_ref[0, 0])                                 # scalar bias from SMEM
    out_ref[...] = out.reshape(B, S, 1)


@jax.jit
def optimized_rnn_forward(inputs, weight_ih, weight_hh, bias, lin_w, lin_b):
    """inputs: (B, S, D) batch-major, like the PyTorch module.

    Returns (output, hidden, inputs):
      output: (B, S, 1), hidden: (B, S, H), inputs passed through unchanged.
    """
    B, S, D = inputs.shape
    H = weight_hh.shape[0]

    x2 = inputs.reshape(B * S, D).astype(jnp.float32)   # free reshape, no transpose
    b2 = bias.reshape(1, H).astype(jnp.float32)
    wl = lin_w.reshape(H, 1).astype(jnp.float32)        # nn.Linear(H,1) weight -> (H,1)
    bl = lin_b.reshape(1, 1).astype(jnp.float32)

    vmem = pl.BlockSpec(memory_space=pltpu.MemorySpace.VMEM)
    smem = pl.BlockSpec(memory_space=pltpu.MemorySpace.SMEM)

    out, hid = pl.pallas_call(
        functools.partial(_rnn_kernel, batch=B, seq_len=S),
        out_shape=(
            jax.ShapeDtypeStruct((B, S, 1), jnp.float32),
            jax.ShapeDtypeStruct((B, S, H), jnp.float32),
        ),
        in_specs=[vmem, vmem, vmem, vmem, vmem, smem],
        out_specs=(vmem, vmem),
    )(x2,
      weight_ih.astype(jnp.float32),
      weight_hh.astype(jnp.float32),
      b2, wl, bl)

    return out, hid, inputs


def _reference_forward(inputs, weight_ih, weight_hh, bias, lin_w, lin_b):
    """Pure-JAX mirror of the PyTorch forward (noise disabled)."""
    B, S, D = inputs.shape
    H = weight_hh.shape[0]
    h = jnp.zeros((B, H), jnp.float32)
    hiddens = []
    for t in range(S):
        x_t = inputs[:, t, :]
        h = jnp.maximum(x_t @ weight_ih + h @ weight_hh + bias, 0.0)
        hiddens.append(h)
    hidden = jnp.stack(hiddens, axis=1)                         # (B, S, H)
    output = hidden @ lin_w.reshape(H, 1) + lin_b.reshape(1,)   # (B, S, 1)
    return output, hidden, inputs


if __name__ == "__main__":
    # Module defaults: input_dim=64, hidden_dim=16, noise_std=0.0
    input_dim, hidden_dim = 64, 16
    batch, seq = 4, 8

    key = jax.random.PRNGKey(0)
    k_x, k_ih, k_hh, k_b, k_lw, k_lb = jax.random.split(key, 6)

    stdv = 1.0 / math.sqrt(hidden_dim)
    weight_ih = jax.random.uniform(k_ih, (input_dim, hidden_dim),
                                   jnp.float32, -stdv, stdv)
    weight_hh = jax.random.uniform(k_hh, (hidden_dim, hidden_dim),
                                   jnp.float32, -stdv, stdv)
    bias = jax.random.uniform(k_b, (hidden_dim,), jnp.float32, -stdv, stdv)
    # nn.Linear(hidden_dim, 1): weight (1, H), bias (1,)
    lin_w = jax.random.uniform(k_lw, (1, hidden_dim), jnp.float32, -stdv, stdv)
    lin_b = jax.random.uniform(k_lb, (1,), jnp.float32, -stdv, stdv)

    inputs = jax.random.normal(k_x, (batch, seq, input_dim), jnp.float32)

    output, hidden, inputs_out = optimized_rnn_forward(
        inputs, weight_ih, weight_hh, bias, lin_w, lin_b)
    jax.block_until_ready((output, hidden, inputs_out))

    ref_out, ref_hid, _ = _reference_forward(
        inputs, weight_ih, weight_hh, bias, lin_w, lin_b)

    assert output.shape == (batch, seq, 1)
    assert hidden.shape == (batch, seq, hidden_dim)
    assert jnp.allclose(output, ref_out, atol=1e-5, rtol=1e-5)
    assert jnp.allclose(hidden, ref_hid, atol=1e-5, rtol=1e-5)
    assert jnp.allclose(inputs_out, inputs)

    print("KERNEL_OK")
</pallas_src>

<mosaic_0001>
module attributes {stable_mosaic.version = 11 : i64} {
  func.func @_rnn_kernel(%arg0: memref<32x64xf32, #tpu.memory_space<vmem>>, %arg1: memref<64x16xf32, #tpu.memory_space<vmem>>, %arg2: memref<16x16xf32, #tpu.memory_space<vmem>>, %arg3: memref<1x16xf32, #tpu.memory_space<vmem>>, %arg4: memref<16x1xf32, #tpu.memory_space<vmem>>, %arg5: memref<1x1xf32, #tpu.memory_space<smem>>, %arg6: memref<4x8x1xf32, #tpu.memory_space<vmem>>, %arg7: memref<4x8x16xf32, #tpu.memory_space<vmem>>) attributes {dimension_semantics = [], scalar_prefetch = 0 : i64, scratch_operands = 0 : i64, tpu.core_type = #tpu.core_type<tc>} {
    %c0 = arith.constant 0 : index
    %c0_0 = arith.constant 0 : index
    %0 = vector.load %arg2[%c0, %c0_0] : memref<16x16xf32, #tpu.memory_space<vmem>>, vector<16x16xf32>
    %c0_1 = arith.constant 0 : index
    %c0_2 = arith.constant 0 : index
    %1 = vector.load %arg0[%c0_1, %c0_2] : memref<32x64xf32, #tpu.memory_space<vmem>>, vector<32x64xf32>
    %c0_3 = arith.constant 0 : index
    %c0_4 = arith.constant 0 : index
    %2 = vector.load %arg1[%c0_3, %c0_4] : memref<64x16xf32, #tpu.memory_space<vmem>>, vector<64x16xf32>
    %cst = arith.constant dense<0.000000e+00> : vector<32x16xf32>
    %3 = tpu.matmul %1, %2, %cst {dimension_numbers = #tpu.dot_dimension_numbers<[1], [0], [0], [1], [0, 0, 1, 1], [], []>} : vector<32x64xf32>, vector<64x16xf32>, vector<32x16xf32> -> vector<32x16xf32>
    %c0_5 = arith.constant 0 : index
    %c0_6 = arith.constant 0 : index
    %4 = vector.load %arg3[%c0_5, %c0_6] : memref<1x16xf32, #tpu.memory_space<vmem>>, vector<1x16xf32>
    %5 = vector.broadcast %4 : vector<1x16xf32> to vector<32x16xf32>
    %6 = arith.addf %3, %5 : vector<32x16xf32>
    %7 = vector.shape_cast %6 : vector<32x16xf32> to vector<4x8x16xf32>
    %cst_7 = arith.constant 0.000000e+00 : f32
    %8 = vector.broadcast %cst_7 : f32 to vector<4x16xf32>
    %9 = vector.extract_strided_slice %7 {offsets = [0, 0, 0], sizes = [4, 1, 16], strides = [1, 1, 1]} : vector<4x8x16xf32> to vector<4x1x16xf32>
    %10 = vector.shape_cast %9 : vector<4x1x16xf32> to vector<4x16xf32>
    %cst_8 = arith.constant dense<0.000000e+00> : vector<4x16xf32>
    %11 = tpu.matmul %8, %0, %cst_8 {dimension_numbers = #tpu.dot_dimension_numbers<[1], [0], [0], [1], [0, 0, 1, 1], [], []>} : vector<4x16xf32>, vector<16x16xf32>, vector<4x16xf32> -> vector<4x16xf32>
    %12 = arith.addf %10, %11 : vector<4x16xf32>
    %cst_9 = arith.constant 0.000000e+00 : f32
    %13 = vector.broadcast %cst_9 : f32 to vector<4x16xf32>
    %14 = arith.maximumf %12, %13 : vector<4x16xf32>
    %c0_10 = arith.constant 0 : index
    %c0_11 = arith.constant 0 : index
    %c0_12 = arith.constant 0 : index
    %15 = vector.load %arg7[%c0_10, %c0_11, %c0_12] : memref<4x8x16xf32, #tpu.memory_space<vmem>>, vector<4x1x16xf32>
    %16 = vector.shape_cast %15 : vector<4x1x16xf32> to vector<4x16xf32>
    %17 = vector.shape_cast %14 : vector<4x16xf32> to vector<4x1x16xf32>
    tpu.vector_store %arg7[%c0_10, %c0_11, %c0_12], %17 {strides = array<i32>} : memref<4x8x16xf32, #tpu.memory_space<vmem>>, vector<4x1x16xf32>,
    %18 = vector.extract_strided_slice %7 {offsets = [0, 1, 0], sizes = [4, 1, 16], strides = [1, 1, 1]} : vector<4x8x16xf32> to vector<4x1x16xf32>
    %19 = vector.shape_cast %18 : vector<4x1x16xf32> to vector<4x16xf32>
    %cst_13 = arith.constant dense<0.000000e+00> : vector<4x16xf32>
    %20 = tpu.matmul %14, %0, %cst_13 {dimension_numbers = #tpu.dot_dimension_numbers<[1], [0], [0], [1], [0, 0, 1, 1], [], []>} : vector<4x16xf32>, vector<16x16xf32>, vector<4x16xf32> -> vector<4x16xf32>
    %21 = arith.addf %19, %20 : vector<4x16xf32>
    %cst_14 = arith.constant 0.000000e+00 : f32
    %22 = vector.broadcast %cst_14 : f32 to vector<4x16xf32>
    %23 = arith.maximumf %21, %22 : vector<4x16xf32>
    %c0_15 = arith.constant 0 : index
    %c1 = arith.constant 1 : index
    %c0_16 = arith.constant 0 : index
    %24 = vector.load %arg7[%c0_15, %c1, %c0_16] : memref<4x8x16xf32, #tpu.memory_space<vmem>>, vector<4x1x16xf32>
    %25 = vector.shape_cast %24 : vector<4x1x16xf32> to vector<4x16xf32>
    %26 = vector.shape_cast %23 : vector<4x16xf32> to vector<4x1x16xf32>
    tpu.vector_store %arg7[%c0_15, %c1, %c0_16], %26 {strides = array<i32>} : memref<4x8x16xf32, #tpu.memory_space<vmem>>, vector<4x1x16xf32>,
    %27 = vector.extract_strided_slice %7 {offsets = [0, 2, 0], sizes = [4, 1, 16], strides = [1, 1, 1]} : vector<4x8x16xf32> to vector<4x1x16xf32>
    %28 = vector.shape_cast %27 : vector<4x1x16xf32> to vector<4x16xf32>
    %cst_17 = arith.constant dense<0.000000e+00> : vector<4x16xf32>
    %29 = tpu.matmul %23, %0, %cst_17 {dimension_numbers = #tpu.dot_dimension_numbers<[1], [0], [0], [1], [0, 0, 1, 1], [], []>} : vector<4x16xf32>, vector<16x16xf32>, vector<4x16xf32> -> vector<4x16xf32>
    %30 = arith.addf %28, %29 : vector<4x16xf32>
    %cst_18 = arith.constant 0.000000e+00 : f32
    %31 = vector.broadcast %cst_18 : f32 to vector<4x16xf32>
    %32 = arith.maximumf %30, %31 : vector<4x16xf32>
    %c0_19 = arith.constant 0 : index
    %c2 = arith.constant 2 : index
    %c0_20 = arith.constant 0 : index
    %33 = vector.load %arg7[%c0_19, %c2, %c0_20] : memref<4x8x16xf32, #tpu.memory_space<vmem>>, vector<4x1x16xf32>
    %34 = vector.shape_cast %33 : vector<4x1x16xf32> to vector<4x16xf32>
    %35 = vector.shape_cast %32 : vector<4x16xf32> to vector<4x1x16xf32>
    tpu.vector_store %arg7[%c0_19, %c2, %c0_20], %35 {strides = array<i32>} : memref<4x8x16xf32, #tpu.memory_space<vmem>>, vector<4x1x16xf32>,
    %36 = vector.extract_strided_slice %7 {offsets = [0, 3, 0], sizes = [4, 1, 16], strides = [1, 1, 1]} : vector<4x8x16xf32> to vector<4x1x16xf32>
    %37 = vector.shape_cast %36 : vector<4x1x16xf32> to vector<4x16xf32>
    %cst_21 = arith.constant dense<0.000000e+00> : vector<4x16xf32>
    %38 = tpu.matmul %32, %0, %cst_21 {dimension_numbers = #tpu.dot_dimension_numbers<[1], [0], [0], [1], [0, 0, 1, 1], [], []>} : vector<4x16xf32>, vector<16x16xf32>, vector<4x16xf32> -> vector<4x16xf32>
    %39 = arith.addf %37, %38 : vector<4x16xf32>
    %cst_22 = arith.constant 0.000000e+00 : f32
    %40 = vector.broadcast %cst_22 : f32 to vector<4x16xf32>
    %41 = arith.maximumf %39, %40 : vector<4x16xf32>
    %c0_23 = arith.constant 0 : index
    %c3 = arith.constant 3 : index
    %c0_24 = arith.constant 0 : index
    %42 = vector.load %arg7[%c0_23, %c3, %c0_24] : memref<4x8x16xf32, #tpu.memory_space<vmem>>, vector<4x1x16xf32>
    %43 = vector.shape_cast %42 : vector<4x1x16xf32> to vector<4x16xf32>
    %44 = vector.shape_cast %41 : vector<4x16xf32> to vector<4x1x16xf32>
    tpu.vector_store %arg7[%c0_23, %c3, %c0_24], %44 {strides = array<i32>} : memref<4x8x16xf32, #tpu.memory_space<vmem>>, vector<4x1x16xf32>,
    %45 = vector.extract_strided_slice %7 {offsets = [0, 4, 0], sizes = [4, 1, 16], strides = [1, 1, 1]} : vector<4x8x16xf32> to vector<4x1x16xf32>
    %46 = vector.shape_cast %45 : vector<4x1x16xf32> to vector<4x16xf32>
    %cst_25 = arith.constant dense<0.000000e+00> : vector<4x16xf32>
    %47 = tpu.matmul %41, %0, %cst_25 {dimension_numbers = #tpu.dot_dimension_numbers<[1], [0], [0], [1], [0, 0, 1, 1], [], []>} : vector<4x16xf32>, vector<16x16xf32>, vector<4x16xf32> -> vector<4x16xf32>
    %48 = arith.addf %46, %47 : vector<4x16xf32>
    %cst_26 = arith.constant 0.000000e+00 : f32
    %49 = vector.broadcast %cst_26 : f32 to vector<4x16xf32>
    %50 = arith.maximumf %48, %49 : vector<4x16xf32>
    %c0_27 = arith.constant 0 : index
    %c4 = arith.constant 4 : index
    %c0_28 = arith.constant 0 : index
    %51 = vector.load %arg7[%c0_27, %c4, %c0_28] : memref<4x8x16xf32, #tpu.memory_space<vmem>>, vector<4x1x16xf32>
    %52 = vector.shape_cast %51 : vector<4x1x16xf32> to vector<4x16xf32>
    %53 = vector.shape_cast %50 : vector<4x16xf32> to vector<4x1x16xf32>
    tpu.vector_store %arg7[%c0_27, %c4, %c0_28], %53 {strides = array<i32>} : memref<4x8x16xf32, #tpu.memory_space<vmem>>, vector<4x1x16xf32>,
    %54 = vector.extract_strided_slice %7 {offsets = [0, 5, 0], sizes = [4, 1, 16], strides = [1, 1, 1]} : vector<4x8x16xf32> to vector<4x1x16xf32>
    %55 = vector.shape_cast %54 : vector<4x1x16xf32> to vector<4x16xf32>
    %cst_29 = arith.constant dense<0.000000e+00> : vector<4x16xf32>
    %56 = tpu.matmul %50, %0, %cst_29 {dimension_numbers = #tpu.dot_dimension_numbers<[1], [0], [0], [1], [0, 0, 1, 1], [], []>} : vector<4x16xf32>, vector<16x16xf32>, vector<4x16xf32> -> vector<4x16xf32>
    %57 = arith.addf %55, %56 : vector<4x16xf32>
    %cst_30 = arith.constant 0.000000e+00 : f32
    %58 = vector.broadcast %cst_30 : f32 to vector<4x16xf32>
    %59 = arith.maximumf %57, %58 : vector<4x16xf32>
    %c0_31 = arith.constant 0 : index
    %c5 = arith.constant 5 : index
    %c0_32 = arith.constant 0 : index
    %60 = vector.load %arg7[%c0_31, %c5, %c0_32] : memref<4x8x16xf32, #tpu.memory_space<vmem>>, vector<4x1x16xf32>
    %61 = vector.shape_cast %60 : vector<4x1x16xf32> to vector<4x16xf32>
    %62 = vector.shape_cast %59 : vector<4x16xf32> to vector<4x1x16xf32>
    tpu.vector_store %arg7[%c0_31, %c5, %c0_32], %62 {strides = array<i32>} : memref<4x8x16xf32, #tpu.memory_space<vmem>>, vector<4x1x16xf32>,
    %63 = vector.extract_strided_slice %7 {offsets = [0, 6, 0], sizes = [4, 1, 16], strides = [1, 1, 1]} : vector<4x8x16xf32> to vector<4x1x16xf32>
    %64 = vector.shape_cast %63 : vector<4x1x16xf32> to vector<4x16xf32>
    %cst_33 = arith.constant dense<0.000000e+00> : vector<4x16xf32>
    %65 = tpu.matmul %59, %0, %cst_33 {dimension_numbers = #tpu.dot_dimension_numbers<[1], [0], [0], [1], [0, 0, 1, 1], [], []>} : vector<4x16xf32>, vector<16x16xf32>, vector<4x16xf32> -> vector<4x16xf32>
    %66 = arith.addf %64, %65 : vector<4x16xf32>
    %cst_34 = arith.constant 0.000000e+00 : f32
    %67 = vector.broadcast %cst_34 : f32 to vector<4x16xf32>
    %68 = arith.maximumf %66, %67 : vector<4x16xf32>
    %c0_35 = arith.constant 0 : index
    %c6 = arith.constant 6 : index
    %c0_36 = arith.constant 0 : index
    %69 = vector.load %arg7[%c0_35, %c6, %c0_36] : memref<4x8x16xf32, #tpu.memory_space<vmem>>, vector<4x1x16xf32>
    %70 = vector.shape_cast %69 : vector<4x1x16xf32> to vector<4x16xf32>
    %71 = vector.shape_cast %68 : vector<4x16xf32> to vector<4x1x16xf32>
    tpu.vector_store %arg7[%c0_35, %c6, %c0_36], %71 {strides = array<i32>} : memref<4x8x16xf32, #tpu.memory_space<vmem>>, vector<4x1x16xf32>,
    %72 = vector.extract_strided_slice %7 {offsets = [0, 7, 0], sizes = [4, 1, 16], strides = [1, 1, 1]} : vector<4x8x16xf32> to vector<4x1x16xf32>
    %73 = vector.shape_cast %72 : vector<4x1x16xf32> to vector<4x16xf32>
    %cst_37 = arith.constant dense<0.000000e+00> : vector<4x16xf32>
    %74 = tpu.matmul %68, %0, %cst_37 {dimension_numbers = #tpu.dot_dimension_numbers<[1], [0], [0], [1], [0, 0, 1, 1], [], []>} : vector<4x16xf32>, vector<16x16xf32>, vector<4x16xf32> -> vector<4x16xf32>
    %75 = arith.addf %73, %74 : vector<4x16xf32>
    %cst_38 = arith.constant 0.000000e+00 : f32
    %76 = vector.broadcast %cst_38 : f32 to vector<4x16xf32>
    %77 = arith.maximumf %75, %76 : vector<4x16xf32>
    %c0_39 = arith.constant 0 : index
    %c7 = arith.constant 7 : index
    %c0_40 = arith.constant 0 : index
    %78 = vector.load %arg7[%c0_39, %c7, %c0_40] : memref<4x8x16xf32, #tpu.memory_space<vmem>>, vector<4x1x16xf32>
    %79 = vector.shape_cast %78 : vector<4x1x16xf32> to vector<4x16xf32>
    %80 = vector.shape_cast %77 : vector<4x16xf32> to vector<4x1x16xf32>
    tpu.vector_store %arg7[%c0_39, %c7, %c0_40], %80 {strides = array<i32>} : memref<4x8x16xf32, #tpu.memory_space<vmem>>, vector<4x1x16xf32>,
    %c0_41 = arith.constant 0 : index
    %c0_42 = arith.constant 0 : index
    %c0_43 = arith.constant 0 : index
    %81 = vector.load %arg7[%c0_41, %c0_42, %c0_43] : memref<4x8x16xf32, #tpu.memory_space<vmem>>, vector<4x8x16xf32>
    %82 = vector.shape_cast %81 : vector<4x8x16xf32> to vector<32x16xf32>
    %c0_44 = arith.constant 0 : index
    %c0_45 = arith.constant 0 : index
    %83 = vector.load %arg4[%c0_44, %c0_45] : memref<16x1xf32, #tpu.memory_space<vmem>>, vector<16x1xf32>
    %cst_46 = arith.constant dense<0.000000e+00> : vector<32x1xf32>
    %84 = tpu.matmul %82, %83, %cst_46 {dimension_numbers = #tpu.dot_dimension_numbers<[1], [0], [0], [1], [0, 0, 1, 1], [], []>} : vector<32x16xf32>, vector<16x1xf32>, vector<32x1xf32> -> vector<32x1xf32>
    %c0_47 = arith.constant 0 : index
    %c0_48 = arith.constant 0 : index
    %85 = memref.load %arg5[%c0_47, %c0_48] : memref<1x1xf32, #tpu.memory_space<smem>>
    %86 = vector.broadcast %85 : f32 to vector<32x1xf32>
    %87 = arith.addf %84, %86 : vector<32x1xf32>
    %88 = vector.shape_cast %87 : vector<32x1xf32> to vector<4x8x1xf32>
    %c0_49 = arith.constant 0 : index
    %c0_50 = arith.constant 0 : index
    %c0_51 = arith.constant 0 : index
    %89 = vector.load %arg6[%c0_49, %c0_50, %c0_51] : memref<4x8x1xf32, #tpu.memory_space<vmem>>, vector<4x8x1xf32>
    tpu.vector_store %arg6[%c0_49, %c0_50, %c0_51], %88 {strides = array<i32>} : memref<4x8x1xf32, #tpu.memory_space<vmem>>, vector<4x8x1xf32>,
    return
  }
}

</mosaic_0001>

<bundles_post_ra>
// kernel: optimized_rnn_forward.1
= control target key start
LH: loop header
LB: loop body
LE: loop exit
PB: predicated region body
PF: predicated region fallthrough
CT: control target
= control target key end

     0   :  { %s844_s0 = inlined_call_operand.vmem [shape: f32[32,64], index: 0, kind: input, shape index: {}]   ;;  %s845_s1 = inlined_call_operand.vmem [shape: f32[64,16], index: 1, kind: input, shape index: {}]   ;;  %s846_s2 = inlined_call_operand.vmem [shape: f32[16,16], index: 2, kind: input, shape index: {}]   ;;  %s847_s3 = inlined_call_operand.vmem [shape: f32[1,16], index: 3, kind: input, shape index: {}]   ;;  %s848_s4 = inlined_call_operand.vmem [shape: f32[16,1], index: 4, kind: input, shape index: {}]   ;;  %s849_s5 = inlined_call_operand.<no memory space> [shape: f32[1,1], index: 5, kind: input, shape index: {}]   ;;  %s850_s6 = inlined_call_operand.vmem [shape: f32[4,8,1], index: 6, kind: output, shape index: {0}]   ;;  %s851_s7 = inlined_call_operand.hbm [shape: f32[4,8,16], index: 7, kind: output, shape index: {1}]  }
   0x1   :  { %v40_v0 = vld [vmem:[%s845_s1 + $0x38] sm:$0xff]  ;;  %v39_v1 = vld [vmem:[%s845_s1 + $0x30] sm:$0xff]  ;;  %v38_v2 = vld [vmem:[%s845_s1 + $0x28] sm:$0xff] }
   0x2   :  { %66 = vmatpush.msra.mxu0 %v40_v0  ;;  %v691_v3 = vld [vmem:[%s846_s2 + $0x8] sm:$0xff]  ;;  %v697_v4 = vld [vmem:[%s846_s2] sm:$0xff] }
   0x3   :  { %105 = vmatpush.msra.mxu1 %v691_v3  ;;  %v37_v5 = vld [vmem:[%s845_s1 + $0x20] sm:$0xff]  ;;  %161 = vmatpush.msra.mxu2 %v691_v3 }
   0x4   :  { %67 = vmatpush.msra.mxu0 %v39_v1  ;;  %375 = vmatpush.msra.mxu3 %v691_v3 }
   0x5   :  { %106 = vmatpush.msra.mxu1 %v697_v4 }
   0x6   :  { %68 = vmatpush.msra.mxu0 %v38_v2 }
   0x7   :  { %14 = vsyncpa [#allocation4], 0  ;;  %v36_v6 = vld [vmem:[%s845_s1 + $0x18] sm:$0xff]  ;;  %v635_v7 = vmov 0.0   ;;  %162 = vmatpush.msra.mxu2 %v697_v4  ;;  %214 = vmatpush.msrb.mxu1 %v691_v3  ;;  %v35_v8 = vld [vmem:[%s845_s1 + $0x10] sm:$0xff]  ;;  %vm45_vm0 = vcmask 523264  }
   0x8   :  { %107 = vmatmul.f32.vlgmr.msra.gmra.mxu1 %v635_v7  ;;  %69 = vmatpush.msra.mxu0 %v37_v5  ;;  %v34_v9 = vld [vmem:[%s845_s1 + $0x8] sm:$0xff]  ;;  %v33_v10 = vld [vmem:[%s845_s1] sm:$0xff]  ;;  %v31_v13 = vld [vmem:[%s844_s0 + $0x10] sm:$0xff]  ;;  %vm127_vm1 = vcmask 122880   ;;  %vm137_vm2 = vcmask 1041409   ;;  %vm140_vm3 = vcmask 1042434  }
   0x9   :  { %320 = vmatpush.msrb.mxu2 %v691_v3  ;;  %376 = vmatpush.msra.mxu3 %v697_v4  ;;  %v29_v11 = vld [vmem:[%s844_s0] sm:$0xff]  ;;  %v30_v12 = vld [vmem:[%s844_s0 + $0x8] sm:$0xff]  ;;  %v32_v14 = vld [vmem:[%s844_s0 + $0x18] sm:$0xff]  ;;  %vm143_vm4 = vcmask 1043459   ;;  %vm87_vm5 = vcmask 130048   ;;  %vm183_vm6 = vcmask 123905  }
   0xa   :  { %70 = vmatpush.msra.mxu0 %v36_v6  ;;  %215 = vmatpush.msrb.mxu1 %v697_v4  ;;  %v608_v15 = vld [vmem:[%s847_s3] ss:$0 sm:$0xff]  ;;  %vm236_vm7 = vcmask 124930   ;;  %vm289_vm8 = vcmask 125955   ;;  %vm343_vm9 = vcmask 126980   ;;  %vm398_vm10 = vcmask 128005  }
   0xb   :  { %321 = vmatpush.msrb.mxu2 %v697_v4  ;;  %vm453_vm11 = vcmask 129030   ;;  %vm508_vm12 = vcmask 130055   ;;  %s575_s9 = sshll.u32 %s851_s7, 4  ;;  %s636_s10 = smov [#allocation3]   ;;  %vm562_vm13 = vcmask 7168   ;;  %s576_s9 = int_to_ptr.hbm [resolvable:$true] %s575_s9 }
   0xc   :  { %267 = vmatpush.msra.mxu1 %v691_v3  ;;  %71 = vmatpush.msra.mxu0 %v35_v8  ;;  %s573_s11 = sshll.u32 %s636_s10, 4  ;;  %s637_s12 = smov 128   ;;  %s574_s11 = int_to_ptr.vmem [resolvable:$true] %s573_s11 }
   0xd   :  { %s638_s13 = smov 8  }
   0xe   :  { %268 = vmatpush.msra.mxu1 %v697_v4  ;;  %72 = vmatpush.msra.mxu0 %v34_v9 }
  0x10   :  { %73 = vmatpush.msra.mxu0 %v33_v10 }
  0x11   :  { %589 = vmatmul.msk.f32.vlgmr.msra.gmra.mxu0 %vm45_vm0, %v29_v11 }
  0x19   :  { %590 = vmatmul.msk.f32.gmra.mxu0 %vm45_vm0, %v30_v12 }
  0x21   :  { %591 = vmatmul.msk.f32.gmra.mxu0 %vm45_vm0, %v31_v13 }
  0x29   :  { %592 = vmatmul.msk.f32.gmra.mxu0 %vm45_vm0, %v32_v14 }
  0x85   :  { %v108_v17 = vpop.f32.mrf.mxu1 }
  0x86   :  { %v112_v21 = vrot.slane %v108_v17, 1  ;;  %v113_v26 = vrot.slane %v108_v17, 2  ;;  %v114_v32 = vrot.slane %v108_v17, 3 }
  0x8e   :  { %v75_v16 = vpop.f32.mrf.mxu0 }
  0x8f   :  { %v740_v18 = vadd.f32 %v608_v15, %v75_v16 }
  0x91   :  { %v119_v19 = vadd.f32 %v108_v17, %v740_v18 }
  0x93   :  { %v123_v20 = vmax.f32 %v119_v19, 0.0 }
  0x95   :  { %128 = vst.msk [vmem:[#allocation3] sm:$0x1] %vm127_vm1, %v123_v20 }
  0x96   :  { %v78_v22 = vpop.f32.mrf.mxu0 }
  0x97   :  { %v744_v23 = vadd.f32 %v608_v15, %v78_v22 }
  0x99   :  { %v120_v24 = vadd.f32 %v112_v21, %v744_v23 }
  0x9b   :  { %v124_v25 = vmax.f32 %v120_v24, 0.0 }
  0x9d   :  { %129 = vst.msk [vmem:[#allocation3 + $0x8] sm:$0x1] %vm127_vm1, %v124_v25  ;;  %v136_v35 = vrot.slane %v124_v25, 7 }
  0x9e   :  { %v81_v27 = vpop.f32.mrf.mxu0 }
  0x9f   :  { %v748_v28 = vadd.f32 %v608_v15, %v81_v27  ;;  %v138_v38 = vsel %vm137_vm2, %v136_v35, %v123_v20 }
  0xa1   :  { %v121_v29 = vadd.f32 %v113_v26, %v748_v28 }
  0xa3   :  { %v125_v30 = vmax.f32 %v121_v29, 0.0 }
  0xa5   :  { %130 = vst.msk [vmem:[#allocation3 + $0x10] sm:$0x1] %vm127_vm1, %v125_v30  ;;  %v139_v36 = vrot.slane %v125_v30, 6 }
  0xa6   :  { %v84_v31 = vpop.f32.mrf.mxu0 }
  0xa7   :  { %v752_v33 = vadd.f32 %v608_v15, %v84_v31  ;;  %v141_v40 = vsel %vm140_vm3, %v139_v36, %v138_v38 }
  0xa9   :  { %v122_v34 = vadd.f32 %v114_v32, %v752_v33 }
  0xab   :  { %v126_v37 = vmax.f32 %v122_v34, 0.0 }
  0xad   :  { %131 = vst.msk [vmem:[#allocation3 + $0x18] sm:$0x1] %vm127_vm1, %v126_v37  ;;  %v142_v39 = vrot.slane %v126_v37, 5 }
  0xaf   :  { %v144_v41 = vsel %vm143_vm4, %v142_v39, %v141_v40 }
  0xb0   :  { %593 = vmatmul.msk.f32.vlgmr.msra.gmra.mxu2 %vm87_vm5, %v144_v41 }
  0xb1   :  { %485 = vmatpush.msra.mxu2 %v691_v3 }
  0xb3   :  { %486 = vmatpush.msra.mxu2 %v697_v4 }
 0x133   :  { %v164_v42 = vpop.f32.mrf.mxu2 }
 0x134   :  { %v168_v43 = vrot.slane %v164_v42, 7  ;;  %v169_v44 = vrot.slane %v164_v42, 1  ;;  %v170_v45 = vrot.slane %v164_v42, 2  ;;  %v176_v46 = vadd.f32 %v164_v42, %v744_v23 }
 0x136   :  { %v175_v47 = vadd.f32 %v168_v43, %v740_v18  ;;  %v177_v48 = vadd.f32 %v169_v44, %v748_v28  ;;  %v178_v49 = vadd.f32 %v170_v45, %v752_v33  ;;  %v180_v50 = vmax.f32 %v176_v46, 0.0 }
 0x138   :  { %v179_v51 = vmax.f32 %v175_v47, 0.0  ;;  %v181_v52 = vmax.f32 %v177_v48, 0.0  ;;  %v182_v53 = vmax.f32 %v178_v49, 0.0  ;;  %185 = vst.msk [vmem:[#allocation3 + $0x8] sm:$0x2] %vm183_vm6, %v180_v50 }
 0x13a   :  { %184 = vst.msk [vmem:[#allocation3] sm:$0x2] %vm183_vm6, %v179_v51  ;;  %v192_v54 = vrot.slane %v179_v51, 1  ;;  %v194_v55 = vrot.slane %v181_v52, 7  ;;  %v196_v57 = vrot.slane %v182_v53, 6 }
 0x13b   :  { %186 = vst.msk [vmem:[#allocation3 + $0x10] sm:$0x2] %vm183_vm6, %v181_v52 }
 0x13c   :  { %187 = vst.msk [vmem:[#allocation3 + $0x18] sm:$0x2] %vm183_vm6, %v182_v53  ;;  %v193_v56 = vsel %vm137_vm2, %v180_v50, %v192_v54 }
 0x13d   :  { %v195_v58 = vsel %vm140_vm3, %v194_v55, %v193_v56 }
 0x13e   :  { %v197_v59 = vsel %vm143_vm4, %v196_v57, %v195_v58 }
 0x13f   :  { %594 = vmatmul.msk.f32.vlgmr.msrb.gmra.mxu1 %vm87_vm5, %v197_v59 }
 0x140   :  { %430 = vmatpush.msrb.mxu1 %v691_v3 }
 0x142   :  { %431 = vmatpush.msrb.mxu1 %v697_v4 }
 0x1bc   :  { %v217_v60 = vpop.f32.mrf.mxu1 }
 0x1bd   :  { %v221_v61 = vrot.slane %v217_v60, 6  ;;  %v222_v62 = vrot.slane %v217_v60, 7  ;;  %v223_v63 = vrot.slane %v217_v60, 1  ;;  %v230_v0 = vadd.f32 %v217_v60, %v748_v28 }
 0x1bf   :  { %v228_v1 = vadd.f32 %v221_v61, %v740_v18  ;;  %v229_v2 = vadd.f32 %v222_v62, %v744_v23  ;;  %v231_v5 = vadd.f32 %v223_v63, %v752_v33  ;;  %v234_v6 = vmax.f32 %v230_v0, 0.0 }
 0x1c1   :  { %v232_v7 = vmax.f32 %v228_v1, 0.0  ;;  %v233_v8 = vmax.f32 %v229_v2, 0.0  ;;  %v235_v9 = vmax.f32 %v231_v5, 0.0  ;;  %239 = vst.msk [vmem:[#allocation3 + $0x10] sm:$0x4] %vm236_vm7, %v234_v6 }
 0x1c3   :  { %237 = vst.msk [vmem:[#allocation3] sm:$0x4] %vm236_vm7, %v232_v7  ;;  %v245_v3 = vrot.slane %v232_v7, 2  ;;  %v246_v4 = vrot.slane %v233_v8, 1  ;;  %v249_v11 = vrot.slane %v235_v9, 7 }
 0x1c4   :  { %238 = vst.msk [vmem:[#allocation3 + $0x8] sm:$0x4] %vm236_vm7, %v233_v8 }
 0x1c5   :  { %240 = vst.msk [vmem:[#allocation3 + $0x18] sm:$0x4] %vm236_vm7, %v235_v9  ;;  %v247_v10 = vsel %vm137_vm2, %v246_v4, %v245_v3 }
 0x1c6   :  { %v248_v12 = vsel %vm140_vm3, %v234_v6, %v247_v10 }
 0x1c7   :  { %v250_v13 = vsel %vm143_vm4, %v249_v11, %v248_v12 }
 0x1c8   :  { %595 = vmatmul.msk.f32.vlgmr.msra.gmra.mxu1 %vm87_vm5, %v250_v13 }
 0x245   :  { %v270_v14 = vpop.f32.mrf.mxu1 }
 0x246   :  { %v274_v15 = vrot.slane %v270_v14, 5  ;;  %v275_v16 = vrot.slane %v270_v14, 6  ;;  %v276_v17 = vrot.slane %v270_v14, 7  ;;  %v284_v19 = vadd.f32 %v270_v14, %v752_v33 }
 0x248   :  { %v281_v20 = vadd.f32 %v274_v15, %v740_v18  ;;  %v282_v21 = vadd.f32 %v275_v16, %v744_v23  ;;  %v283_v22 = vadd.f32 %v276_v17, %v748_v28  ;;  %v288_v24 = vmax.f32 %v284_v19, 0.0 }
 0x24a   :  { %v285_v25 = vmax.f32 %v281_v20, 0.0  ;;  %v286_v26 = vmax.f32 %v282_v21, 0.0  ;;  %v287_v27 = vmax.f32 %v283_v22, 0.0  ;;  %293 = vst.msk [vmem:[#allocation3 + $0x18] sm:$0x8] %vm289_vm8, %v288_v24 }
 0x24c   :  { %290 = vst.msk [vmem:[#allocation3] sm:$0x8] %vm289_vm8, %v285_v25  ;;  %v298_v29 = vrot.slane %v285_v25, 3  ;;  %v299_v30 = vrot.slane %v286_v26, 2  ;;  %v301_v31 = vrot.slane %v287_v27, 1 }
 0x24d   :  { %291 = vst.msk [vmem:[#allocation3 + $0x8] sm:$0x8] %vm289_vm8, %v286_v26 }
 0x24e   :  { %292 = vst.msk [vmem:[#allocation3 + $0x10] sm:$0x8] %vm289_vm8, %v287_v27  ;;  %v300_v32 = vsel %vm137_vm2, %v299_v30, %v298_v29 }
 0x24f   :  { %v302_v34 = vsel %vm140_vm3, %v301_v31, %v300_v32 }
 0x250   :  { %v303_v35 = vsel %vm143_vm4, %v288_v24, %v302_v34 }
 0x251   :  { %596 = vmatmul.msk.f32.vlgmr.msrb.gmra.mxu2 %vm87_vm5, %v303_v35 }
 0x2d4   :  { %v323_v36 = vpop.f32.mrf.mxu2 }
 0x2d5   :  { %v327_v37 = vrot.slane %v323_v36, 4  ;;  %v328_v38 = vrot.slane %v323_v36, 5  ;;  %v329_v39 = vrot.slane %v323_v36, 6  ;;  %v330_v40 = vrot.slane %v323_v36, 7  ;;  %v518_v36 = vld [vmem:[%s848_s4 + $0x8] sm:$0xff] }
 0x2d6   :  { %547 = vmatpush.msrb.mxu3 %v518_v36 }
 0x2d7   :  { %v335_v41 = vadd.f32 %v327_v37, %v740_v18  ;;  %v336_v42 = vadd.f32 %v328_v38, %v744_v23  ;;  %v337_v43 = vadd.f32 %v329_v39, %v748_v28  ;;  %v338_v44 = vadd.f32 %v330_v40, %v752_v33  ;;  %v517_v37 = vld [vmem:[%s848_s4] sm:$0xff] }
 0x2d8   :  { %548 = vmatpush.msrb.mxu3 %v517_v37 }
 0x2d9   :  { %v339_v45 = vmax.f32 %v335_v41, 0.0  ;;  %v340_v46 = vmax.f32 %v336_v42, 0.0  ;;  %v341_v47 = vmax.f32 %v337_v43, 0.0  ;;  %v342_v48 = vmax.f32 %v338_v44, 0.0 }
 0x2db   :  { %344 = vst.msk [vmem:[#allocation3] sm:$0x10] %vm343_vm9, %v339_v45  ;;  %v352_v49 = vrot.slane %v339_v45, 4  ;;  %v353_v50 = vrot.slane %v340_v46, 3  ;;  %v355_v51 = vrot.slane %v341_v47, 2  ;;  %v357_v53 = vrot.slane %v342_v48, 1 }
 0x2dc   :  { %345 = vst.msk [vmem:[#allocation3 + $0x8] sm:$0x10] %vm343_vm9, %v340_v46 }
 0x2dd   :  { %346 = vst.msk [vmem:[#allocation3 + $0x10] sm:$0x10] %vm343_vm9, %v341_v47  ;;  %v354_v52 = vsel %vm137_vm2, %v353_v50, %v352_v49 }
 0x2de   :  { %347 = vst.msk [vmem:[#allocation3 + $0x18] sm:$0x10] %vm343_vm9, %v342_v48  ;;  %v356_v54 = vsel %vm140_vm3, %v355_v51, %v354_v52 }
 0x2df   :  { %v358_v55 = vsel %vm143_vm4, %v357_v53, %v356_v54 }
 0x2e0   :  { %597 = vmatmul.msk.f32.vlgmr.msra.gmra.mxu3 %vm87_vm5, %v358_v55 }
 0x363   :  { %v378_v56 = vpop.f32.mrf.mxu3 }
 0x364   :  { %v382_v57 = vrot.slane %v378_v56, 3  ;;  %v383_v58 = vrot.slane %v378_v56, 4  ;;  %v384_v59 = vrot.slane %v378_v56, 5  ;;  %v385_v60 = vrot.slane %v378_v56, 6 }
 0x366   :  { %v390_v61 = vadd.f32 %v382_v57, %v740_v18  ;;  %v391_v62 = vadd.f32 %v383_v58, %v744_v23  ;;  %v392_v63 = vadd.f32 %v384_v59, %v748_v28  ;;  %v393_v0 = vadd.f32 %v385_v60, %v752_v33 }
 0x368   :  { %v394_v1 = vmax.f32 %v390_v61, 0.0  ;;  %v395_v2 = vmax.f32 %v391_v62, 0.0  ;;  %v396_v5 = vmax.f32 %v392_v63, 0.0  ;;  %v397_v6 = vmax.f32 %v393_v0, 0.0 }
 0x36a   :  { %399 = vst.msk [vmem:[#allocation3] sm:$0x20] %vm398_vm10, %v394_v1  ;;  %v407_v7 = vrot.slane %v394_v1, 5  ;;  %v408_v8 = vrot.slane %v395_v2, 4  ;;  %v410_v9 = vrot.slane %v396_v5, 3  ;;  %v412_v4 = vrot.slane %v397_v6, 2 }
 0x36b   :  { %400 = vst.msk [vmem:[#allocation3 + $0x8] sm:$0x20] %vm398_vm10, %v395_v2 }
 0x36c   :  { %401 = vst.msk [vmem:[#allocation3 + $0x10] sm:$0x20] %vm398_vm10, %v396_v5  ;;  %v409_v3 = vsel %vm137_vm2, %v408_v8, %v407_v7 }
 0x36d   :  { %402 = vst.msk [vmem:[#allocation3 + $0x18] sm:$0x20] %vm398_vm10, %v397_v6  ;;  %v411_v10 = vsel %vm140_vm3, %v410_v9, %v409_v3 }
 0x36e   :  { %v413_v11 = vsel %vm143_vm4, %v412_v4, %v411_v10 }
 0x36f   :  { %598 = vmatmul.msk.f32.vlgmr.msrb.gmra.mxu1 %vm87_vm5, %v413_v11 }
 0x3ec   :  { %v433_v12 = vpop.f32.mrf.mxu1 }
 0x3ed   :  { %v437_v13 = vrot.slane %v433_v12, 2  ;;  %v438_v14 = vrot.slane %v433_v12, 3  ;;  %v439_v15 = vrot.slane %v433_v12, 4  ;;  %v440_v16 = vrot.slane %v433_v12, 5 }
 0x3ef   :  { %v445_v17 = vadd.f32 %v437_v13, %v740_v18  ;;  %v446_v19 = vadd.f32 %v438_v14, %v744_v23  ;;  %v447_v20 = vadd.f32 %v439_v15, %v748_v28  ;;  %v448_v21 = vadd.f32 %v440_v16, %v752_v33 }
 0x3f1   :  { %v449_v22 = vmax.f32 %v445_v17, 0.0  ;;  %v450_v24 = vmax.f32 %v446_v19, 0.0  ;;  %v451_v25 = vmax.f32 %v447_v20, 0.0  ;;  %v452_v26 = vmax.f32 %v448_v21, 0.0 }
 0x3f3   :  { %454 = vst.msk [vmem:[#allocation3] sm:$0x40] %vm453_vm11, %v449_v22  ;;  %v462_v27 = vrot.slane %v449_v22, 6  ;;  %v463_v29 = vrot.slane %v450_v24, 5  ;;  %v465_v30 = vrot.slane %v451_v25, 4  ;;  %v467_v31 = vrot.slane %v452_v26, 3 }
 0x3f4   :  { %455 = vst.msk [vmem:[#allocation3 + $0x8] sm:$0x40] %vm453_vm11, %v450_v24 }
 0x3f5   :  { %456 = vst.msk [vmem:[#allocation3 + $0x10] sm:$0x40] %vm453_vm11, %v451_v25  ;;  %v464_v32 = vsel %vm137_vm2, %v463_v29, %v462_v27 }
 0x3f6   :  { %457 = vst.msk [vmem:[#allocation3 + $0x18] sm:$0x40] %vm453_vm11, %v452_v26  ;;  %v466_v34 = vsel %vm140_vm3, %v465_v30, %v464_v32 }
 0x3f7   :  { %v468_v35 = vsel %vm143_vm4, %v467_v31, %v466_v34 }
 0x3f8   :  { %599 = vmatmul.msk.f32.vlgmr.msra.gmra.mxu2 %vm87_vm5, %v468_v35 }
 0x47b   :  { %v488_v38 = vpop.f32.mrf.mxu2 }
 0x47c   :  { %v492_v39 = vrot.slane %v488_v38, 1  ;;  %v493_v40 = vrot.slane %v488_v38, 2  ;;  %v494_v41 = vrot.slane %v488_v38, 3  ;;  %v495_v42 = vrot.slane %v488_v38, 4 }
 0x47e   :  { %v500_v43 = vadd.f32 %v492_v39, %v740_v18  ;;  %v501_v44 = vadd.f32 %v493_v40, %v744_v23  ;;  %v502_v45 = vadd.f32 %v494_v41, %v748_v28  ;;  %v503_v46 = vadd.f32 %v495_v42, %v752_v33 }
 0x47f   :  { %v520_v28 = vstv %s849_s5 }
 0x480   :  { %v504_v47 = vmax.f32 %v500_v43, 0.0  ;;  %v505_v48 = vmax.f32 %v501_v44, 0.0  ;;  %v506_v49 = vmax.f32 %v502_v45, 0.0  ;;  %v507_v50 = vmax.f32 %v503_v46, 0.0 }
 0x482   :  { %509 = vst.msk [vmem:[#allocation3] sm:$0x80] %vm508_vm12, %v504_v47 }
 0x483   :  { %510 = vst.msk [vmem:[#allocation3 + $0x8] sm:$0x80] %vm508_vm12, %v505_v48 }
 0x484   :  { %511 = vst.msk [vmem:[#allocation3 + $0x10] sm:$0x80] %vm508_vm12, %v506_v49 }
 0x485   :  { %512 = vst.msk [vmem:[#allocation3 + $0x18] sm:$0x80] %vm508_vm12, %v507_v50 }
 0x486   :  { %581 = dma.vmem_to_hbm [thread:$0]  %s574_s11, 512, %s576_s9, [#allocation4], %s637_s12, %s637_s12, %s638_s13  }
 0x489   :  { %v513_v51 = vld [vmem:[#allocation3] sm:$0xff] }
 0x48a   :  { %600 = vmatmul.msk.f32.vlgmr.msrb.gmra.mxu3 %vm87_vm5, %v513_v51  ;;  %v514_v52 = vld [vmem:[#allocation3 + $0x8] sm:$0xff] }
 0x48b   :  { %v515_v18 = vld [vmem:[#allocation3 + $0x10] sm:$0xff] }
 0x48c   :  { %v516_v23 = vld [vmem:[#allocation3 + $0x18] sm:$0xff] }
 0x492   :  { %601 = vmatmul.msk.f32.gmra.mxu3 %vm87_vm5, %v514_v52 }
 0x49a   :  { %602 = vmatmul.msk.f32.gmra.mxu3 %vm87_vm5, %v515_v18 }
 0x4a2   :  { %603 = vmatmul.msk.f32.gmra.mxu3 %vm87_vm5, %v516_v23 }
 0x50d   :  { %v550_v33 = vpop.f32.mrf.mxu3 }
 0x50e   :  { %v551_v53 = vadd.f32 %v550_v33, %v520_v28 }
 0x510   :  { %563 = vst.msk [vmem:[%s850_s6] sm:$0xff] %vm562_vm13, %v551_v53 }
 0x515   :  { %v553_v54 = vpop.f32.mrf.mxu3 }
 0x516   :  { %v554_v55 = vadd.f32 %v553_v54, %v520_v28 }
 0x518   :  { %564 = vst.msk [vmem:[%s850_s6 + $0x8] sm:$0xff] %vm562_vm13, %v554_v55 }
 0x51d   :  { %v556_v56 = vpop.f32.mrf.mxu3 }
 0x51e   :  { %v557_v57 = vadd.f32 %v556_v56, %v520_v28 }
 0x520   :  { %565 = vst.msk [vmem:[%s850_s6 + $0x10] sm:$0xff] %vm562_vm13, %v557_v57 }
 0x525   :  { %v559_v58 = vpop.f32.mrf.mxu3 }
 0x526   :  { %v560_v59 = vadd.f32 %v559_v58, %v520_v28 }
 0x528   :  { %566 = vst.msk [vmem:[%s850_s6 + $0x18] sm:$0xff] %vm562_vm13, %v560_v59 }
 0x529   :  { %633 = dma.done.wait [#allocation4], 512  }
 0x52a   :  { %634 = vsyncadd [#allocation4], 4294966784 }
 0x52b   :  { %588 = vsyncpa [#allocation4], 1 }

</bundles_post_ra>
